<compile_context>
chip_gen: v6e
topology: v6e:2x2x1
jax: 0.10.0
libtpu: 0.0.40
codegen_flags: <defaults>
</compile_context>

<pallas_src>
import functools

import jax
import jax.numpy as jnp
from jax.experimental import pallas as pl
from jax.experimental.pallas import tpu as pltpu


def _contrastive_tile_kernel(ti_ref, tj_ref,
                             frow_ref, fm2col_ref,
                             sqrow_ref, sqcol_ref,
                             yrow_ref, ycol_ref,
                             out_ref, *, margin: float,
                             steps_per_core: int, n_tiles: int):
    core = pl.program_id(0)
    step = pl.program_id(1)
    flat = core * steps_per_core + step

    @pl.when(step == 0)
    def _():
        out_ref[...] = jnp.zeros_like(out_ref)

    # MXU: the column operand already carries the -2 factor (folded in the
    # wrapper), so this directly yields -2 * <x_i, x_j> with f32 accumulation.
    gram_m2 = jax.lax.dot_general(
        frow_ref[...], fm2col_ref[...],
        dimension_numbers=(((1,), (1,)), ((), ())),
        preferred_element_type=jnp.float32)                          # (tn, tn)

    # Squared distances from precomputed per-row norms (both orientations come
    # from the wrapper, so no in-kernel transpose).
    d2 = jnp.maximum(sqrow_ref[...] + sqcol_ref[...] + gram_m2, 0.0)
    dist = jnp.sqrt(d2)
    clamped = jnp.maximum(margin - dist, 1e-8)

    # Select-based blend: no bool->f32 cast, no (1-gt), no extra multiplies.
    # Positive branch reuses d2 (== dist^2).
    tile = jnp.where(yrow_ref[...] != ycol_ref[...], clamped * clamped, d2)

    valid = flat < n_tiles                       # gates megacore padding slots
    is_diag = ti_ref[flat] == tj_ref[flat]

    # Off-diagonal (ti < tj) tile: every unordered pair appears exactly once
    # (its mirror block is never enumerated) -> weight 0.5 (includes the global
    # "loss / 2" of the reference).
    @pl.when(jnp.logical_and(valid, jnp.logical_not(is_diag)))
    def _():
        out_ref[...] += 0.5 * jnp.sum(tile)

    # Diagonal tile: mask i == j exactly (fixes padded-row diagonal leakage and
    # real-row VPU/MXU |x|^2 mismatch); the remaining symmetric sum counts each
    # i < j pair twice -> weight 0.25.  The iota cost is only paid on the few
    # diagonal tiles thanks to pl.when.
    @pl.when(jnp.logical_and(valid, is_diag))
    def _():
        rid = jax.lax.broadcasted_iota(jnp.int32, tile.shape, 0)
        cid = jax.lax.broadcasted_iota(jnp.int32, tile.shape, 1)
        masked = jnp.where(rid == cid, 0.0, tile)
        out_ref[...] += 0.25 * jnp.sum(masked)


def _round_up(x: int, m: int) -> int:
    return ((x + m - 1) // m) * m


def contrastive_loss(feat, y, *, margin: float = 1.0, size_average: bool = True,
                     block_n: int = 256, num_core_splits: int = 2):
    """feat: (N, d) float array; y: (N,) integer labels."""
    feat = jnp.asarray(feat)
    y = jnp.asarray(y)
    n, d = feat.shape

    # Tile edge: multiple of 128 when it is smaller than the (padded) batch so
    # the lane-oriented (1, tn) blocks stay lane-aligned; otherwise the full
    # (sublane-rounded) batch in a single tile.
    block_n = max(128, _round_up(block_n, 128))
    tn = min(block_n, _round_up(n, 8))
    n_pad = _round_up(n, tn)
    pad = n_pad - n

    # Per-row squared norms in f32 (features keep their own dtype for the MXU).
    sq = jnp.sum(feat.astype(jnp.float32) ** 2, axis=-1)            # (n,)
    y_i = y.astype(jnp.int32)

    if pad:
        # Padded rows: zero features, a big fake squared norm and distinct
        # sentinel labels => every OFF-DIAGONAL pair touching a padded row has
        # gt=1 and dist > margin, so it contributes (1e-8)^2 ~ 0; the padded
        # DIAGONAL entries are removed exactly by the in-kernel i==j mask.
        # (Assumes real labels never use values near INT32_MIN.)
        big = jnp.float32((abs(float(margin)) + 1.0) ** 2)
        feat_p = jnp.concatenate([feat, jnp.zeros((pad, d), feat.dtype)], axis=0)
        sq_p = jnp.concatenate([sq, jnp.full((pad,), big, jnp.float32)], axis=0)
        sentinels = jnp.iinfo(jnp.int32).min + 1 + jnp.arange(pad, dtype=jnp.int32)
        y_p = jnp.concatenate([y_i, sentinels], axis=0)
    else:
        feat_p, sq_p, y_p = feat, sq, y_i

    # Fold the -2 into the column MXU operand (exact power-of-two scale; O(N*d)
    # once in the wrapper, same per-tile DMA bytes).
    feat_m2 = (feat_p.astype(jnp.float32) * -2.0).astype(feat_p.dtype)

    # Both orientations built in the wrapper -> no in-kernel transposes.
    sq_row = sq_p.reshape(n_pad, 1)
    sq_col = sq_p.reshape(1, n_pad)
    y_row = y_p.reshape(n_pad, 1)
    y_col = y_p.reshape(1, n_pad)

    # Enumerate only the upper-triangular tile blocks (ti <= tj).
    t = n_pad // tn
    tri = [(i, j) for i in range(t) for j in range(i, t)]
    n_tiles = len(tri)

    # Split tiles across TensorCores (megacore on v7x; serial elsewhere).
    num_core_splits = max(1, int(num_core_splits))
    steps_per_core = -(-n_tiles // num_core_splits)        # ceil div
    total_slots = num_core_splits * steps_per_core
    ti_list = [p[0] for p in tri] + [0] * (total_slots - n_tiles)
    tj_list = [p[1] for p in tri] + [0] * (total_slots - n_tiles)
    ti_arr = jnp.asarray(ti_list, dtype=jnp.int32)
    tj_arr = jnp.asarray(tj_list, dtype=jnp.int32)

    kernel = functools.partial(_contrastive_tile_kernel, margin=float(margin),
                               steps_per_core=steps_per_core, n_tiles=n_tiles)

    itemsize = jnp.dtype(feat_p.dtype).itemsize
    cost = pl.CostEstimate(
        flops=n_tiles * (2 * tn * tn * d + 6 * tn * tn),
        transcendentals=n_tiles * tn * tn,                           # sqrt
        bytes_accessed=n_tiles * (2 * tn * d * itemsize + 2 * tn * (4 + 4)) + 4,
    )

    # Only raise the scoped VMEM limit when the estimated need is large
    # (2 feature blocks x double-buffer + (tn,tn) f32 temps + headroom).
    feat_block_bytes = tn * d * itemsize
    vmem_est = 4 * feat_block_bytes + 6 * tn * tn * 4 + (1 << 20)
    compiler_kwargs = dict(dimension_semantics=("parallel", "arbitrary"))
    if vmem_est > (12 << 20):
        compiler_kwargs["vmem_limit_bytes"] = int(min(vmem_est * 3 // 2, 100 << 20))

    S = steps_per_core
    in_specs = [
        pl.BlockSpec((tn, d), lambda c, s, ti, tj: (ti[c * S + s], 0)),   # row feats
        pl.BlockSpec((tn, d), lambda c, s, ti, tj: (tj[c * S + s], 0)),   # col feats * -2
        pl.BlockSpec((tn, 1), lambda c, s, ti, tj: (ti[c * S + s], 0)),   # row |x|^2
        pl.BlockSpec((1, tn), lambda c, s, ti, tj: (0, tj[c * S + s])),   # col |x|^2
        pl.BlockSpec((tn, 1), lambda c, s, ti, tj: (ti[c * S + s], 0)),   # row labels
        pl.BlockSpec((1, tn), lambda c, s, ti, tj: (0, tj[c * S + s])),   # col labels
    ]
    out_spec = pl.BlockSpec((1, 1, 1), lambda c, s, ti, tj: (c, 0, 0))    # per-core partial

    out = pl.pallas_call(
        kernel,
        out_shape=jax.ShapeDtypeStruct((num_core_splits, 1, 1), jnp.float32),
        grid_spec=pltpu.PrefetchScalarGridSpec(
            num_scalar_prefetch=2,
            grid=(num_core_splits, steps_per_core),
            in_specs=in_specs,
            out_specs=out_spec,
        ),
        compiler_params=pltpu.CompilerParams(**compiler_kwargs),
        cost_estimate=cost,
    )(ti_arr, tj_arr, feat_p, feat_m2, sq_row, sq_col, y_row, y_col)

    loss = jnp.sum(out)
    if size_average:
        num_pairs = max(1, n * (n - 1) // 2)   # == dist.size(0) from pdist
        loss = loss / jnp.float32(num_pairs)
    return loss


def _reference(feat, y, margin, size_average):
    feat = feat.astype(jnp.float32)
    n = feat.shape[0]
    diffs = feat[:, None, :] - feat[None, :, :]
    dist_full = jnp.sqrt(jnp.maximum(jnp.sum(diffs * diffs, axis=-1), 0.0))
    iu, ju = jnp.triu_indices(n, k=1)
    dist = dist_full[iu, ju]
    gt = (y[iu] != y[ju]).astype(jnp.float32)
    clamped = jnp.maximum(margin - dist, 1e-8)
    loss = jnp.sum((1.0 - gt) * dist * dist + gt * clamped * clamped) / 2.0
    return loss / dist.shape[0] if size_average else loss


if __name__ == "__main__":
    key = jax.random.PRNGKey(0)
    k1, k2, k3, k4 = jax.random.split(key, 4)

    # Case 1: single-tile path (N=8, d=32), matching the module's (N, d) batch.
    N, D = 8, 32
    feat = jax.random.normal(k1, (N, D), dtype=jnp.float32)
    y = jax.random.randint(k2, (N,), 0, 3, dtype=jnp.int32)
    margin = 1.25
    out = jax.block_until_ready(
        contrastive_loss(feat, y, margin=margin, size_average=True))
    ref = _reference(feat, y, margin, size_average=True)
    assert jnp.allclose(out, ref, rtol=1e-4, atol=1e-5), (out, ref)

    # Case 2: multi-tile triangular grid + row padding (N=200 with 128-wide tiles).
    N2, D2 = 200, 16
    feat2 = jax.random.normal(k3, (N2, D2), dtype=jnp.float32)
    y2 = jax.random.randint(k4, (N2,), 0, 5, dtype=jnp.int32)
    out2 = jax.block_until_ready(
        contrastive_loss(feat2, y2, margin=1.0, size_average=True, block_n=128))
    ref2 = _reference(feat2, y2, 1.0, size_average=True)
    assert jnp.allclose(out2, ref2, rtol=1e-4, atol=1e-4), (out2, ref2)

    print("KERNEL_OK")
</pallas_src>

<mosaic_0001>
module attributes {stable_mosaic.version = 11 : i64} {
  func.func @_contrastive_tile_kernel(%arg0: i32, %arg1: i32, %arg2: memref<2xi32, #tpu.memory_space<smem>>, %arg3: memref<2xi32, #tpu.memory_space<smem>>, %arg4: memref<8x32xf32, #tpu.memory_space<vmem>>, %arg5: memref<8x32xf32, #tpu.memory_space<vmem>>, %arg6: memref<8x1xf32, #tpu.memory_space<vmem>>, %arg7: memref<1x8xf32, #tpu.memory_space<vmem>>, %arg8: memref<8x1xi32, #tpu.memory_space<vmem>>, %arg9: memref<1x8xi32, #tpu.memory_space<vmem>>, %arg10: memref<1x1x1xf32, #tpu.memory_space<vmem>>) attributes {dimension_semantics = [#tpu.dimension_semantics<parallel>, #tpu.dimension_semantics<arbitrary>], iteration_bounds = array<i64: 2, 1>, scalar_prefetch = 2 : i64, scratch_operands = 0 : i64, tpu.core_type = #tpu.core_type<tc>, window_params = [{transform_indices = @transform_0, window_bounds = array<i64: 8, 32>}, {transform_indices = @transform_1, window_bounds = array<i64: 8, 32>}, {transform_indices = @transform_2, window_bounds = array<i64: 8, 1>}, {transform_indices = @transform_3, window_bounds = array<i64: 1, 8>}, {transform_indices = @transform_4, window_bounds = array<i64: 8, 1>}, {transform_indices = @transform_5, window_bounds = array<i64: 1, 8>}, {transform_indices = @transform_6, window_bounds = array<i64: 1, 1, 1>}]} {
    %c1_i32 = arith.constant 1 : i32
    %0 = arith.muli %arg0, %c1_i32 : i32
    %1 = arith.addi %0, %arg1 : i32
    %c0_i32 = arith.constant 0 : i32
    %2 = arith.cmpi eq, %arg1, %c0_i32 : i32
    %3 = arith.extui %2 : i1 to i32
    %c0_i32_0 = arith.constant 0 : i32
    %4 = arith.cmpi ne, %3, %c0_i32_0 : i32
    scf.if %4 {
      %cst_18 = arith.constant 0.000000e+00 : f32
      %41 = vector.broadcast %cst_18 : f32 to vector<1x1x1xf32>
      %c0_19 = arith.constant 0 : index
      %c0_20 = arith.constant 0 : index
      %c0_21 = arith.constant 0 : index
      %42 = vector.load %arg10[%c0_19, %c0_20, %c0_21] : memref<1x1x1xf32, #tpu.memory_space<vmem>>, vector<1x1x1xf32>
      tpu.vector_store %arg10[%c0_19, %c0_20, %c0_21], %41 {strides = array<i32>} : memref<1x1x1xf32, #tpu.memory_space<vmem>>, vector<1x1x1xf32>,
    } else {
    }
    %c0 = arith.constant 0 : index
    %c0_1 = arith.constant 0 : index
    %5 = vector.load %arg4[%c0, %c0_1] : memref<8x32xf32, #tpu.memory_space<vmem>>, vector<8x32xf32>
    %c0_2 = arith.constant 0 : index
    %c0_3 = arith.constant 0 : index
    %6 = vector.load %arg5[%c0_2, %c0_3] : memref<8x32xf32, #tpu.memory_space<vmem>>, vector<8x32xf32>
    %cst = arith.constant dense<0.000000e+00> : vector<8x8xf32>
    %7 = tpu.matmul %5, %6, %cst {dimension_numbers = #tpu.dot_dimension_numbers<[1], [1], [0], [0], [0, 0, 1, 0], [], []>} : vector<8x32xf32>, vector<8x32xf32>, vector<8x8xf32> -> vector<8x8xf32>
    %c0_4 = arith.constant 0 : index
    %c0_5 = arith.constant 0 : index
    %8 = vector.load %arg6[%c0_4, %c0_5] : memref<8x1xf32, #tpu.memory_space<vmem>>, vector<8x1xf32>
    %c0_6 = arith.constant 0 : index
    %c0_7 = arith.constant 0 : index
    %9 = vector.load %arg7[%c0_6, %c0_7] : memref<1x8xf32, #tpu.memory_space<vmem>>, vector<1x8xf32>
    %10 = vector.broadcast %8 : vector<8x1xf32> to vector<8x8xf32>
    %11 = vector.broadcast %9 : vector<1x8xf32> to vector<8x8xf32>
    %12 = arith.addf %10, %11 : vector<8x8xf32>
    %13 = arith.addf %12, %7 : vector<8x8xf32>
    %cst_8 = arith.constant 0.000000e+00 : f32
    %14 = vector.broadcast %cst_8 : f32 to vector<8x8xf32>
    %15 = arith.maximumf %13, %14 : vector<8x8xf32>
    %16 = math.sqrt %15 : vector<8x8xf32>
    %cst_9 = arith.constant 1.250000e+00 : f32
    %17 = vector.broadcast %cst_9 : f32 to vector<8x8xf32>
    %18 = arith.subf %17, %16 : vector<8x8xf32>
    %cst_10 = arith.constant 9.99999993E-9 : f32
    %19 = vector.broadcast %cst_10 : f32 to vector<8x8xf32>
    %20 = arith.maximumf %18, %19 : vector<8x8xf32>
    %c0_11 = arith.constant 0 : index
    %c0_12 = arith.constant 0 : index
    %21 = vector.load %arg8[%c0_11, %c0_12] : memref<8x1xi32, #tpu.memory_space<vmem>>, vector<8x1xi32>
    %c0_13 = arith.constant 0 : index
    %c0_14 = arith.constant 0 : index
    %22 = vector.load %arg9[%c0_13, %c0_14] : memref<1x8xi32, #tpu.memory_space<vmem>>, vector<1x8xi32>
    %23 = vector.broadcast %21 : vector<8x1xi32> to vector<8x8xi32>
    %24 = vector.broadcast %22 : vector<1x8xi32> to vector<8x8xi32>
    %25 = arith.cmpi ne, %23, %24 : vector<8x8xi32>
    %26 = arith.mulf %20, %20 : vector<8x8xf32>
    %27 = arith.select %25, %26, %15 : vector<8x8xi1>, vector<8x8xf32>
    %c1_i32_15 = arith.constant 1 : i32
    %28 = arith.cmpi slt, %1, %c1_i32_15 : i32
    %29 = arith.index_cast %1 : i32 to index
    %30 = memref.load %arg2[%29] : memref<2xi32, #tpu.memory_space<smem>>
    %31 = arith.index_cast %1 : i32 to index
    %32 = memref.load %arg3[%31] : memref<2xi32, #tpu.memory_space<smem>>
    %33 = arith.cmpi eq, %30, %32 : i32
    %true = arith.constant true
    %34 = arith.xori %33, %true : i1
    %35 = arith.andi %28, %34 : i1
    %36 = arith.extui %35 : i1 to i32
    %c0_i32_16 = arith.constant 0 : i32
    %37 = arith.cmpi ne, %36, %c0_i32_16 : i32
    scf.if %37 {
      %c0_18 = arith.constant 0 : index
      %c0_19 = arith.constant 0 : index
      %c0_20 = arith.constant 0 : index
      %41 = vector.load %arg10[%c0_18, %c0_19, %c0_20] : memref<1x1x1xf32, #tpu.memory_space<vmem>>, vector<1x1x1xf32>
      %42 = vector.shape_cast %27 : vector<8x8xf32> to vector<1x8x8xf32>
      %cst_21 = arith.constant dense<0.000000e+00> : vector<1xf32>
      %43 = vector.multi_reduction <add>, %42, %cst_21 [1, 2] : vector<1x8x8xf32> to vector<1xf32>
      %44 = vector.shape_cast %43 : vector<1xf32> to vector<1x1x1xf32>
      %45 = vector.extract %44[0, 0, 0] : f32 from vector<1x1x1xf32>
      %cst_22 = arith.constant 5.000000e-01 : f32
      %46 = arith.mulf %cst_22, %45 : f32
      %47 = vector.broadcast %46 : f32 to vector<1x1x1xf32>
      %48 = arith.addf %41, %47 : vector<1x1x1xf32>
      %c0_23 = arith.constant 0 : index
      %c0_24 = arith.constant 0 : index
      %c0_25 = arith.constant 0 : index
      %49 = vector.load %arg10[%c0_23, %c0_24, %c0_25] : memref<1x1x1xf32, #tpu.memory_space<vmem>>, vector<1x1x1xf32>
      tpu.vector_store %arg10[%c0_23, %c0_24, %c0_25], %48 {strides = array<i32>} : memref<1x1x1xf32, #tpu.memory_space<vmem>>, vector<1x1x1xf32>,
    } else {
    }
    %38 = arith.andi %28, %33 : i1
    %39 = arith.extui %38 : i1 to i32
    %c0_i32_17 = arith.constant 0 : i32
    %40 = arith.cmpi ne, %39, %c0_i32_17 : i32
    scf.if %40 {
      %41 = tpu.iota {dimensions = array<i32: 0>} : vector<8x8xi32>
      %42 = tpu.iota {dimensions = array<i32: 1>} : vector<8x8xi32>
      %43 = arith.cmpi eq, %41, %42 : vector<8x8xi32>
      %cst_18 = arith.constant 0.000000e+00 : f32
      %44 = vector.broadcast %cst_18 : f32 to vector<8x8xf32>
      %45 = arith.select %43, %44, %27 : vector<8x8xi1>, vector<8x8xf32>
      %c0_19 = arith.constant 0 : index
      %c0_20 = arith.constant 0 : index
      %c0_21 = arith.constant 0 : index
      %46 = vector.load %arg10[%c0_19, %c0_20, %c0_21] : memref<1x1x1xf32, #tpu.memory_space<vmem>>, vector<1x1x1xf32>
      %47 = vector.shape_cast %45 : vector<8x8xf32> to vector<1x8x8xf32>
      %cst_22 = arith.constant dense<0.000000e+00> : vector<1xf32>
      %48 = vector.multi_reduction <add>, %47, %cst_22 [1, 2] : vector<1x8x8xf32> to vector<1xf32>
      %49 = vector.shape_cast %48 : vector<1xf32> to vector<1x1x1xf32>
      %50 = vector.extract %49[0, 0, 0] : f32 from vector<1x1x1xf32>
      %cst_23 = arith.constant 2.500000e-01 : f32
      %51 = arith.mulf %cst_23, %50 : f32
      %52 = vector.broadcast %51 : f32 to vector<1x1x1xf32>
      %53 = arith.addf %46, %52 : vector<1x1x1xf32>
      %c0_24 = arith.constant 0 : index
      %c0_25 = arith.constant 0 : index
      %c0_26 = arith.constant 0 : index
      %54 = vector.load %arg10[%c0_24, %c0_25, %c0_26] : memref<1x1x1xf32, #tpu.memory_space<vmem>>, vector<1x1x1xf32>
      tpu.vector_store %arg10[%c0_24, %c0_25, %c0_26], %53 {strides = array<i32>} : memref<1x1x1xf32, #tpu.memory_space<vmem>>, vector<1x1x1xf32>,
    } else {
    }
    return
  }
  func.func @transform_0(%arg0: i32, %arg1: i32, %arg2: memref<2xi32, #tpu.memory_space<smem>>, %arg3: memref<2xi32, #tpu.memory_space<smem>>) -> (i32, i32) {
    %c1_i32 = arith.constant 1 : i32
    %0 = arith.muli %arg0, %c1_i32 : i32
    %1 = arith.addi %0, %arg1 : i32
    %2 = arith.index_cast %1 : i32 to index
    %3 = memref.load %arg2[%2] : memref<2xi32, #tpu.memory_space<smem>>
    %c0_i32 = arith.constant 0 : i32
    %c0_i32_0 = arith.constant 0 : i32
    return %3, %c0_i32 : i32, i32
  }
  func.func @transform_1(%arg0: i32, %arg1: i32, %arg2: memref<2xi32, #tpu.memory_space<smem>>, %arg3: memref<2xi32, #tpu.memory_space<smem>>) -> (i32, i32) {
    %c1_i32 = arith.constant 1 : i32
    %0 = arith.muli %arg0, %c1_i32 : i32
    %1 = arith.addi %0, %arg1 : i32
    %2 = arith.index_cast %1 : i32 to index
    %3 = memref.load %arg3[%2] : memref<2xi32, #tpu.memory_space<smem>>
    %c0_i32 = arith.constant 0 : i32
    %c0_i32_0 = arith.constant 0 : i32
    return %3, %c0_i32 : i32, i32
  }
  func.func @transform_2(%arg0: i32, %arg1: i32, %arg2: memref<2xi32, #tpu.memory_space<smem>>, %arg3: memref<2xi32, #tpu.memory_space<smem>>) -> (i32, i32) {
    %c1_i32 = arith.constant 1 : i32
    %0 = arith.muli %arg0, %c1_i32 : i32
    %1 = arith.addi %0, %arg1 : i32
    %2 = arith.index_cast %1 : i32 to index
    %3 = memref.load %arg2[%2] : memref<2xi32, #tpu.memory_space<smem>>
    %c0_i32 = arith.constant 0 : i32
    %c0_i32_0 = arith.constant 0 : i32
    return %3, %c0_i32 : i32, i32
  }
  func.func @transform_3(%arg0: i32, %arg1: i32, %arg2: memref<2xi32, #tpu.memory_space<smem>>, %arg3: memref<2xi32, #tpu.memory_space<smem>>) -> (i32, i32) {
    %c1_i32 = arith.constant 1 : i32
    %0 = arith.muli %arg0, %c1_i32 : i32
    %1 = arith.addi %0, %arg1 : i32
    %2 = arith.index_cast %1 : i32 to index
    %3 = memref.load %arg3[%2] : memref<2xi32, #tpu.memory_space<smem>>
    %c0_i32 = arith.constant 0 : i32
    %c0_i32_0 = arith.constant 0 : i32
    return %c0_i32, %3 : i32, i32
  }
  func.func @transform_4(%arg0: i32, %arg1: i32, %arg2: memref<2xi32, #tpu.memory_space<smem>>, %arg3: memref<2xi32, #tpu.memory_space<smem>>) -> (i32, i32) {
    %c1_i32 = arith.constant 1 : i32
    %0 = arith.muli %arg0, %c1_i32 : i32
    %1 = arith.addi %0, %arg1 : i32
    %2 = arith.index_cast %1 : i32 to index
    %3 = memref.load %arg2[%2] : memref<2xi32, #tpu.memory_space<smem>>
    %c0_i32 = arith.constant 0 : i32
    %c0_i32_0 = arith.constant 0 : i32
    return %3, %c0_i32 : i32, i32
  }
  func.func @transform_5(%arg0: i32, %arg1: i32, %arg2: memref<2xi32, #tpu.memory_space<smem>>, %arg3: memref<2xi32, #tpu.memory_space<smem>>) -> (i32, i32) {
    %c1_i32 = arith.constant 1 : i32
    %0 = arith.muli %arg0, %c1_i32 : i32
    %1 = arith.addi %0, %arg1 : i32
    %2 = arith.index_cast %1 : i32 to index
    %3 = memref.load %arg3[%2] : memref<2xi32, #tpu.memory_space<smem>>
    %c0_i32 = arith.constant 0 : i32
    %c0_i32_0 = arith.constant 0 : i32
    return %c0_i32, %3 : i32, i32
  }
  func.func @transform_6(%arg0: i32, %arg1: i32, %arg2: memref<2xi32, #tpu.memory_space<smem>>, %arg3: memref<2xi32, #tpu.memory_space<smem>>) -> (i32, i32, i32) {
    %c0_i32 = arith.constant 0 : i32
    %c0_i32_0 = arith.constant 0 : i32
    %c0_i32_1 = arith.constant 0 : i32
    return %arg0, %c0_i32, %c0_i32_0 : i32, i32, i32
  }
}

</mosaic_0001>

<bundles_post_ra>
// kernel: tpu_custom_call.1
= control target key start
LH: loop header
LB: loop body
LE: loop exit
PB: predicated region body
PF: predicated region fallthrough
CT: control target
= control target key end

     0   :  { %s968_s0 = inlined_call_operand.vmem [shape: s32[2], index: 0, kind: input, shape index: {}]   ;;  %s969_s2 = inlined_call_operand.vmem [shape: f32[8,32], index: 2, kind: input, shape index: {}]   ;;  %s970_s3 = inlined_call_operand.vmem [shape: f32[8,32], index: 3, kind: input, shape index: {}]   ;;  %s971_s4 = inlined_call_operand.vmem [shape: f32[8,1], index: 4, kind: input, shape index: {}]   ;;  %s972_s5 = inlined_call_operand.vmem [shape: f32[1,8], index: 5, kind: input, shape index: {}]   ;;  %s973_s6 = inlined_call_operand.vmem [shape: s32[8,1], index: 6, kind: input, shape index: {}]   ;;  %s974_s7 = inlined_call_operand.vmem [shape: s32[1,8], index: 7, kind: input, shape index: {}]   ;;  %s975_s8 = inlined_call_operand.vmem [shape: f32[2,1,1], index: 8, kind: output, shape index: {}]   ;;  %s976_s1 = inlined_call_operand.hbm [shape: s32[2], index: 1, kind: input, shape index: {}]  }
   0x1   :  { %s13_s29 = sshll.u32 %s968_s0, 4  ;;  %s14_s29 = int_to_ptr.vmem [resolvable:$true] %s13_s29 }
   0x2   :  { %s773_s30 = scalar_lea.vmem %s14_s29, 16  ;;  %p778_p1 = scmp.lt.s32.totalorder %s14_s29, %s14_s29 }
   0x3   :  { %p774_p0 = scmp.ne.s32.totalorder %s14_s29, %s773_s30  ;;  %p779_p2 = scmp.lt.s32.totalorder %s773_s30, %s773_s30 }
   0x5   :  { %p780_p3 = por %p779_p2, %p778_p1 }
   0x7   :  { %p781_p4 = pnand %p780_p3, %p774_p0 }
   0x9   :  { %784 = shalt.err (!%p781_p4)  }
   0xa   :  { %s819_s9 = smov [#allocation3]   ;;  %s820_s10 = smov [#allocation4]  }
   0xb   :  { %16 = dma.vmem_to_smem %s14_s29, 16, %s819_s9, [#allocation2] }
   0xc   :  { %18 = dma.hbm_to_smem %s976_s1, 16, %s820_s10, [#allocation2] }
   0xd   :  { %805 = dma.done.wait [#allocation2], 32 }
   0xe   :  { %806 = vsyncadd [#allocation2], 4294967264 }
   0xf   :  { %20 = sfence }
  0x10   :  { %s875_s13 = smov 0   ;;  %s877_s0 = smov 0  }
  0x11   :  { %s879_s14 = smov 0  }
  0x12 LB: > { %s38_s1 = sadd.s32 1, %s813_s0  ;;  %p719_p5 = scmp.ge.s32.totalorder %s817_s14, 1  ;;  %s817_s14 = sphi %s879_s14, %s26_s14   ;;  %s813_s0 = sphi %s877_s0, %s979_s0   ;;  %s809_s13 = sphi %s875_s13, %s978_s13  }
  0x13   : > { %p40_p6 = scmp.ge.s32.totalorder %s38_s1, 2  ;;  %p324_p7 = scmp.lt.s32.totalorder %s817_s14, 3 }
  0x15   : > { %s981_s1 = smov (%p40_p6, %s38_s1), 0  ;;  %p325_p8 = pnand %p719_p5, %p324_p7 }
  0x16   : > { %p427_p9 = scmp.lt.s32.totalorder (!%p325_p8), %s809_s13, 1  ;;  %s897_s15 = sld [smem:[#allocation3 + %s809_s13]] (!%p325_p8) }
  0x17   : > { %328 = sbr.rel (%p325_p8) target bundleno = 689 (0x2b1), region = 44  ;;  %s900_s16 = sld [smem:[#allocation4 + %s809_s13]] (!%p325_p8) }
  0x18   : > { %s390_s18 = sld [smem:[#allocation4 + %s809_s13]] (!%p325_p8) }
  0x19   : > { %s382_s22 = sld [smem:[#allocation3 + %s809_s13]] (!%p325_p8) }
  0x1a   : > { %s398_s23 = sld [smem:[#allocation3 + %s809_s13]] (!%p325_p8) }
  0x1b   : > { %s413_s24 = sld [smem:[#allocation3 + %s809_s13]] (!%p325_p8) }
  0x1c   : > { %v821_v0 = vmov 0.0   ;;  %vm822_vm0 = vmmov 0   ;;  %s428_s17 = scalar_select %p427_p9, %s809_s13, 1  ;;  %vm435_vm1 = vcmask 0   ;;  %v823_v1 = vmov 0  }
  0x1d   : > { %732 = vmatprep.subr.mxu0 %v821_v0  ;;  %734 = vmatprep.mubr.msk.f32.mxu0 %vm822_vm0, %v821_v0  ;;  %p556_p10 = scmp.eq.s32.totalorder %s897_s15, %s900_s16  ;;  %p557_p11 = scmp.ne.s32.totalorder %s897_s15, %s900_s16  ;;  %vm439_vm2 = vcmask 261120  }
  0x1e   : > { %770 = vset.pattern.permute.xlu0 %v823_v1  ;;  %s909_s21 = scalar_lea.vmem %s975_s8, %s428_s17  ;;  %p391_p13 = scmp.lt.s32.totalorder %s390_s18, 0 }
  0x1f   : > { %436 = vst.msk [vmem:[%s909_s21] sm:$0x1] %vm435_vm1, %v821_v0  ;;  %p922_p12 = pnand %p557_p11, %p427_p9  ;;  %p383_p0 = scmp.lt.s32.totalorder %s382_s22, 0 }
  0x20   : > { %s983_s18 = smov (!%p391_p13, %s390_s18), 0  ;;  %p399_p1 = scmp.lt.s32.totalorder %s398_s23, 0 }
  0x21   : > { %s985_s22 = smov (!%p383_p0, %s382_s22), 0  ;;  %s721_s26 = sshll.u32 %s983_s18, 3 }
  0x22   : > { %s394_s29 = scalar_lea.vmem %s970_s3, %s721_s26  ;;  %s720_s30 = sshll.u32 %s985_s22, 3 }
  0x23   : > { %v438_v2 = vld [vmem:[%s394_s29] sm:$0xff]  ;;  %s386_s11 = scalar_lea.vmem %s969_s2, %s720_s30  ;;  %p414_p2 = scmp.lt.s32.totalorder %s413_s24, 0 }
  0x24   : > { %733 = vmatpush3.xpose.msk.msra.mxu0 %vm439_vm2, %v438_v2  ;;  %v437_v3 = vld [vmem:[%s386_s11] sm:$0xff]  ;;  %s987_s23 = smov (!%p399_p1, %s398_s23), 0  ;;  %s406_s28 = sld [smem:[#allocation4 + %s809_s13]] }
  0x25   : > { %s989_s24 = smov (!%p414_p2, %s413_s24), 0  ;;  %s722_s12 = sshll.u32 %s987_s23, 3 }
  0x26   : > { %s402_s19 = scalar_lea.vmem %s971_s4, %s722_s12  ;;  %s723_s20 = sshll.u32 %s989_s24, 3 }
  0x27   : > { %735 = vmatmul.mubr.msk.f32.vlgmr.msra.gmra.mxu0 %vm439_vm2, %v437_v3  ;;  %v516_v4 = vld [vmem:[%s402_s19] sm:$0xff]  ;;  %s417_s27 = scalar_lea.vmem %s973_s6, %s723_s20  ;;  %s421_s24 = sld [smem:[#allocation4 + %s809_s13]] }
  0x28   : > { %520 = vperm.xlu0 %770, %v516_v4   ;;  %v541_v5 = vld [vmem:[%s417_s27] sm:$0xff] }
  0x2a   : > { %p407_p3 = scmp.lt.s32.totalorder %s406_s28, 0 }
  0x2c   : > { %544 = vperm.xlu0 %770, %v541_v5   ;;  %s991_s28 = smov (!%p407_p3, %s406_s28), 0 }
  0x2d   : > { %s409_s30 = scalar_lea.vmem %s972_s5, %s991_s28  ;;  %p422_p4 = scmp.lt.s32.totalorder %s421_s24, 0 }
  0x2e   : > { %v726_v6 = vld [vmem:[%s409_s30] ss:$0 sm:$0xff] }
  0x2f   : > { %s993_s24 = smov (!%p422_p4, %s421_s24), 0 }
  0x30   : > { %s424_s11 = scalar_lea.vmem %s974_s7, %s993_s24 }
  0x31   : > { %v727_v19 = vld [vmem:[%s424_s11] ss:$0 sm:$0xff] }
  0xa3   : > { %v521_v7 = vpop.permute.xlu0 %520 }
  0xa4   : > { %v529_v8 = vadd.f32 %v726_v6, %v521_v7 }
  0xa7   : > { %v545_v20 = vpop.permute.xlu0 %544 }
  0xa8   : > { %vm550_vm5 = vcmp.ne.s32.totalorder %v545_v20, %v727_v19 }
  0xe7   : > { %v512_v9 = vpop.f32.mrf.mxu0 }
  0xe8   : > { %v530_v10 = vadd.f32 %v529_v8, %v512_v9 }
  0xe9   : > { %v736_v11 = vpop.f32.mrf.mxu0 }
  0xea   : > { %v531_v12 = vmax.f32 %v530_v10, 0.0 }
  0xec   : > { %771 = vrsqrt.f32 %v531_v12  ;;  %vm534_vm3 = vcmp.eq.f32.partialorder %v531_v12, inf  ;;  %v537_v15 = vand.u32 2147483648, %v531_v12  ;;  %vm536_vm4 = vcmp.eq.f32.partialorder %v531_v12, 0.0 }
  0xf9   : > { %v772_v13 = vpop.eup %771 }
  0xfa   : > { %v533_v14 = vmul.f32 %v772_v13, %v531_v12 }
  0xfc   : > { %v535_v16 = vsel %vm534_vm3, %v531_v12, %v533_v14 }
  0xfd   : > { %v538_v17 = vsel %vm536_vm4, %v537_v15, %v535_v16 }
  0xfe   : > { %v539_v18 = vsub.f32 1.25, %v538_v17 }
 0x100   : > { %v540_v21 = vmax.f32 %v539_v18, 1e-08  ;;  %561 = sbr.rel (%p922_p12) target bundleno = 469 (0x1d5), region = 52 }
 0x102   : > { %v551_v22 = vmul.f32 %v540_v21, %v540_v21 }
 0x104   : > { %v552_v23 = vsel %vm550_vm5, %v551_v22, %v531_v12 }
 0x105   : > { %vm563_vm6 = vcmask 64512   ;;  %v562_v32 = vld [vmem:[%s909_s21] sm:$0x1] }
 0x106   : > { %v564_v24 = vsel %vm563_vm6, %v552_v23, 0.0 }
 0x107   : > { %565 = vadd.xlane.f32.xlu0 %v564_v24 }
 0x190   : > { %v566_v25 = vpop.xlane.xlu0 %565 }
 0x191   : > { %v567_v26 = vrot.slane %v566_v25, 4 }
 0x193   : > { %v568_v27 = vadd.f32 %v567_v26, %v566_v25 }
 0x195   : > { %v569_v28 = vrot.slane %v568_v27, 2 }
 0x197   : > { %v570_v29 = vadd.f32 %v569_v28, %v568_v27 }
 0x199   : > { %v571_v30 = vrot.slane %v570_v29, 1 }
 0x19b   : > { %v572_v31 = vadd.f32 %v571_v30, %v570_v29 }
 0x19d   : > { %737 = vpush %v572_v31 }
 0x1ce   : > { %s738_s12 = spop %737 }
 0x1cf   : > { %s574_s17 = smul.f32 0.5, %s738_s12 }
 0x1d1   : > { %v575_v33 = vstv %s574_s17 }
 0x1d2   : > { %v576_v34 = vadd.f32 %v575_v33, %v562_v32 }
 0x1d4   : > { %578 = vst.msk [vmem:[%s909_s21] sm:$0x1] %vm435_vm1, %v576_v34 }
 0x1d5 PF: > { %p579_p5 = pnand %p556_p10, %p427_p9 }
 0x1d7   : > { %582 = sbr.rel (%p579_p5) target bundleno = 689 (0x2b1), region = 56 }
 0x1dc   : > { %v583_v35 = vlaneseq  ;;  %vm590_vm7 = vcmask 64512   ;;  %v589_v47 = vld [vmem:[%s909_s21] sm:$0x1] }
 0x1de   : > { %v584_v36 = vshrl.u32 %v583_v35, 7  ;;  %v586_v37 = vand.u32 127, %v583_v35 }
 0x1e0   : > { %vm587_vm8 = vcmp.eq.s32.totalorder %v584_v36, %v586_v37 }
 0x1e1   : > { %v588_v38 = vsel %vm587_vm8, 0.0, %v552_v23 }
 0x1e2   : > { %v591_v39 = vsel %vm590_vm7, %v588_v38, 0.0 }
 0x1e3   : > { %592 = vadd.xlane.f32.xlu0 %v591_v39 }
 0x26c   : > { %v593_v40 = vpop.xlane.xlu0 %592 }
 0x26d   : > { %v594_v41 = vrot.slane %v593_v40, 4 }
 0x26f   : > { %v595_v42 = vadd.f32 %v594_v41, %v593_v40 }
 0x271   : > { %v596_v43 = vrot.slane %v595_v42, 2 }
 0x273   : > { %v597_v44 = vadd.f32 %v596_v43, %v595_v42 }
 0x275   : > { %v598_v45 = vrot.slane %v597_v44, 1 }
 0x277   : > { %v599_v46 = vadd.f32 %v598_v45, %v597_v44 }
 0x279   : > { %739 = vpush %v599_v46 }
 0x2aa   : > { %s740_s13 = spop %739 }
 0x2ab   : > { %s601_s15 = smul.f32 0.25, %s740_s13 }
 0x2ad   : > { %v602_v48 = vstv %s601_s15 }
 0x2ae   : > { %v603_v49 = vadd.f32 %v602_v48, %v589_v47 }
 0x2b0   : > { %605 = vst.msk [vmem:[%s909_s21] sm:$0x1] %vm435_vm1, %v603_v49 }
 0x2b1 PF: > { %s26_s14 = sadd.s32 1, %s817_s14   ;;  %s978_s13 = smov %s813_s0 }
 0x2b2   : > { %p23_p6 = scmp.ge.s32.totalorder %s26_s14, 4   ;;  %s979_s0 = smov %s981_s1 }
 0x2b4   :  { %25 = sbr.rel (!%p23_p6) target bundleno = 18 (0x12), region = 101 }

</bundles_post_ra>
